<compile_context>
chip_gen: v6e
topology: v6e:2x2x1
jax: 0.10.0
libtpu: 0.0.40
codegen_flags: <defaults>
</compile_context>

<pallas_src>
import jax
import jax.numpy as jnp
from jax import lax
from jax.experimental import pallas as pl
from jax.experimental.pallas import tpu as pltpu

IN_FEATURES = 30
DIM = 30            # Linear(30, DIM); see TODO above.
P_DROP = 0.2

F_PAD = 32          # feature axis padded 30 -> 32
PACK = 4            # 4 batch rows packed into the 128-lane axis
LANES = PACK * F_PAD            # 128
TR_MAX = 2048       # packed rows per grid step (= 8192 batch rows per tile)


def _round_up(x, m):
    return (x + m - 1) // m * m


# ---- counter-based PRNG (lowbias32 integer hash); plain jnp ops only so it lowers on
# ---- Mosaic TPU and also runs under the CPU interpret path.
def _hash_u32(x):
    x = x ^ (x >> 16)
    x = x * jnp.uint32(0x7FEB352D)
    x = x ^ (x >> 15)
    x = x * jnp.uint32(0x846CA68B)
    x = x ^ (x >> 16)
    return x


def _bits_to_unit(bits):
    # top 24 bits -> f32 uniform in [0, 1); exact integer path, no bitcasts needed
    return (bits >> 8).astype(jnp.int32).astype(jnp.float32) * jnp.float32(1.0 / (1 << 24))


def _draw_keys(seed):
    seed_u = seed.astype(jnp.uint32) if hasattr(seed, "astype") else jnp.uint32(seed)
    k1 = _hash_u32(seed_u + jnp.uint32(0x9E3779B9))   # t1 stream
    k2 = _hash_u32(seed_u + jnp.uint32(0x85EBCA6B))   # dropout-mask stream
    k3 = _hash_u32(seed_u + jnp.uint32(0xC2B2AE35))   # t3 stream
    return k1, k2, k3


def mymodel_kernel(seed_ref, wbig_ref, bbig_ref, o_ref):
    tr, lanes = o_ref.shape                         # (TR, 128) lane-dense packed layout

    row = lax.broadcasted_iota(jnp.int32, (tr, lanes), 0)
    col = lax.broadcasted_iota(jnp.int32, (tr, lanes), 1)
    # Global flat element index (== batch_row * F_PAD + feature): grid-invariant, so
    # each tile automatically gets an independent random stream from the same seed.
    gidx = ((pl.program_id(0) * tr + row) * lanes + col).astype(jnp.uint32)

    k1, k2, k3 = _draw_keys(seed_ref[0])
    t1 = _bits_to_unit(_hash_u32(gidx ^ k1))        # rand_like(z)
    um = _bits_to_unit(_hash_u32(gidx ^ k2))        # dropout uniforms
    t3 = _bits_to_unit(_hash_u32(gidx ^ k3))        # rand_like(z)

    # dropout(t1, p): zero with prob p, scale kept values by 1/(1-p)
    t2 = jnp.where(um >= jnp.float32(P_DROP),
                   t1 * jnp.float32(1.0 / (1.0 - P_DROP)),
                   jnp.float32(0.0))

    # proj(t3): block-diagonal (128,128) weight applies W^T to each of the 4 packed
    # batch rows independently; padded rows/cols of W are zero so pad lanes contribute 0.
    proj = jnp.dot(t3, wbig_ref[...], preferred_element_type=jnp.float32) + bbig_ref[...]

    o_ref[...] = (t3 + t2 + proj).astype(o_ref.dtype)


def _packed_weight_bias(w, b):
    w = jnp.asarray(w, jnp.float32)                 # (DIM, IN) PyTorch layout
    b = jnp.asarray(b, jnp.float32)                 # (DIM,)
    wt_pad = jnp.zeros((F_PAD, F_PAD), jnp.float32).at[:IN_FEATURES, :DIM].set(w.T)
    w_big = jnp.kron(jnp.eye(PACK, dtype=jnp.float32), wt_pad)          # (128, 128)
    b_pad = jnp.zeros((F_PAD,), jnp.float32).at[:DIM].set(b)
    b_big = jnp.tile(b_pad, (PACK,)).reshape(1, LANES)                  # (1, 128)
    return w_big, b_big


def mymodel_forward(z, w, b, seed=0):
    """z: (B, 30) (only shape/dtype used), w: (30, 30), b: (30,) -> (B, 30)."""
    B, F = z.shape
    assert F == IN_FEATURES

    R = pl.cdiv(B, PACK)                        # packed rows needed
    TR = min(TR_MAX, _round_up(R, 8))           # packed rows per tile (multiple of 8)
    Rp = _round_up(R, TR)
    grid = (Rp // TR,)

    w_big, b_big = _packed_weight_bias(w, b)
    seed_arr = jnp.asarray([seed], dtype=jnp.int32)

    packed = pl.pallas_call(
        mymodel_kernel,
        out_shape=jax.ShapeDtypeStruct((Rp, LANES), z.dtype),
        grid_spec=pltpu.PrefetchScalarGridSpec(
            num_scalar_prefetch=1,              # seed lives in SMEM
            grid=grid,
            in_specs=[
                pl.BlockSpec((LANES, LANES), lambda i, seed: (0, 0)),   # weight: VMEM-resident
                pl.BlockSpec((1, LANES), lambda i, seed: (0, 0)),       # bias:   VMEM-resident
            ],
            out_specs=pl.BlockSpec((TR, LANES), lambda i, seed: (i, 0)),
        ),
        compiler_params=pltpu.CompilerParams(
            dimension_semantics=("parallel",),
        ),
    )(seed_arr, w_big, b_big)

    # Un-pack: row-major (Rp,128) is bit-identical to (Rp*4,32); then drop batch/feature pad.
    return packed.reshape(Rp * PACK, F_PAD)[:B, :DIM]


def reference_forward(B, w, b, seed, dtype=jnp.float32):
    """Pure-JAX re-implementation of the exact same math/PRNG (for correctness check)."""
    R = pl.cdiv(B, PACK)
    TR = min(TR_MAX, _round_up(R, 8))
    Rp = _round_up(R, TR)
    Bp = Rp * PACK
    idx = jnp.arange(Bp * F_PAD, dtype=jnp.uint32).reshape(Bp, F_PAD)
    k1, k2, k3 = _draw_keys(jnp.int32(seed))
    t1 = _bits_to_unit(_hash_u32(idx ^ k1))
    um = _bits_to_unit(_hash_u32(idx ^ k2))
    t3 = _bits_to_unit(_hash_u32(idx ^ k3))
    t2 = jnp.where(um >= jnp.float32(P_DROP),
                   t1 * jnp.float32(1.0 / (1.0 - P_DROP)),
                   jnp.float32(0.0))
    wt_pad = jnp.zeros((F_PAD, F_PAD), jnp.float32).at[:IN_FEATURES, :DIM].set(
        jnp.asarray(w, jnp.float32).T)
    b_pad = jnp.zeros((F_PAD,), jnp.float32).at[:DIM].set(jnp.asarray(b, jnp.float32))
    proj = t3 @ wt_pad + b_pad
    out = (t3 + t2 + proj).astype(dtype)
    return out[:B, :DIM]


if __name__ == "__main__":
    key = jax.random.PRNGKey(0)
    kz, kw, kb = jax.random.split(key, 3)

    B = 8
    z = jax.random.normal(kz, (B, IN_FEATURES), dtype=jnp.float32)

    # Deterministic Linear init (PyTorch-style uniform(-1/sqrt(in), 1/sqrt(in)))
    bound = 1.0 / (IN_FEATURES ** 0.5)
    w = jax.random.uniform(kw, (DIM, IN_FEATURES), minval=-bound, maxval=bound,
                           dtype=jnp.float32)
    b = jax.random.uniform(kb, (DIM,), minval=-bound, maxval=bound, dtype=jnp.float32)

    out = mymodel_forward(z, w, b, seed=0)
    jax.block_until_ready(out)

    assert out.shape == (B, DIM) and out.dtype == jnp.float32
    assert bool(jnp.all(jnp.isfinite(out)))

    ref = reference_forward(B, w, b, seed=0)
    max_err = float(jnp.max(jnp.abs(out - ref)))
    assert max_err < 5e-2, f"mismatch vs pure-JAX reference: {max_err}"

    print("KERNEL_OK")
</pallas_src>

<mosaic_0001>
module attributes {stable_mosaic.version = 11 : i64} {
  func.func @mymodel_kernel(%arg0: i32, %arg1: memref<1xi32, #tpu.memory_space<smem>>, %arg2: memref<128x128xf32, #tpu.memory_space<vmem>>, %arg3: memref<1x128xf32, #tpu.memory_space<vmem>>, %arg4: memref<8x128xf32, #tpu.memory_space<vmem>>) attributes {dimension_semantics = [#tpu.dimension_semantics<parallel>], iteration_bounds = array<i64: 1>, scalar_prefetch = 1 : i64, scratch_operands = 0 : i64, tpu.core_type = #tpu.core_type<tc>, window_params = [{pipeline_mode = #tpu.pipeline_mode<synchronous>, transform_indices = @transform_0, window_bounds = array<i64: 128, 128>}, {pipeline_mode = #tpu.pipeline_mode<synchronous>, transform_indices = @transform_1, window_bounds = array<i64: 1, 128>}, {transform_indices = @transform_2, window_bounds = array<i64: 8, 128>}]} {
    %0 = tpu.iota {dimensions = array<i32: 0>} : vector<8x128xi32>
    %1 = tpu.iota {dimensions = array<i32: 1>} : vector<8x128xi32>
    %c8_i32 = arith.constant 8 : i32
    %2 = arith.muli %arg0, %c8_i32 : i32
    %3 = vector.broadcast %2 : i32 to vector<8x128xi32>
    %4 = arith.addi %3, %0 : vector<8x128xi32>
    %c128_i32 = arith.constant 128 : i32
    %5 = vector.broadcast %c128_i32 : i32 to vector<8x128xi32>
    %6 = arith.muli %4, %5 : vector<8x128xi32>
    %7 = arith.addi %6, %1 : vector<8x128xi32>
    %c0 = arith.constant 0 : index
    %8 = memref.load %arg1[%c0] : memref<1xi32, #tpu.memory_space<smem>>
    %c-1640531527_i32 = arith.constant -1640531527 : i32
    %9 = arith.addi %8, %c-1640531527_i32 : i32
    %c16_i32 = arith.constant 16 : i32
    %10 = arith.shrui %9, %c16_i32 : i32
    %11 = arith.xori %9, %10 : i32
    %c2146121005_i32 = arith.constant 2146121005 : i32
    %12 = arith.muli %11, %c2146121005_i32 : i32
    %c15_i32 = arith.constant 15 : i32
    %13 = arith.shrui %12, %c15_i32 : i32
    %14 = arith.xori %12, %13 : i32
    %c-2073254261_i32 = arith.constant -2073254261 : i32
    %15 = arith.muli %14, %c-2073254261_i32 : i32
    %c16_i32_0 = arith.constant 16 : i32
    %16 = arith.shrui %15, %c16_i32_0 : i32
    %17 = arith.xori %15, %16 : i32
    %c-2048144789_i32 = arith.constant -2048144789 : i32
    %18 = arith.addi %8, %c-2048144789_i32 : i32
    %c16_i32_1 = arith.constant 16 : i32
    %19 = arith.shrui %18, %c16_i32_1 : i32
    %20 = arith.xori %18, %19 : i32
    %c2146121005_i32_2 = arith.constant 2146121005 : i32
    %21 = arith.muli %20, %c2146121005_i32_2 : i32
    %c15_i32_3 = arith.constant 15 : i32
    %22 = arith.shrui %21, %c15_i32_3 : i32
    %23 = arith.xori %21, %22 : i32
    %c-2073254261_i32_4 = arith.constant -2073254261 : i32
    %24 = arith.muli %23, %c-2073254261_i32_4 : i32
    %c16_i32_5 = arith.constant 16 : i32
    %25 = arith.shrui %24, %c16_i32_5 : i32
    %26 = arith.xori %24, %25 : i32
    %c-1028477387_i32 = arith.constant -1028477387 : i32
    %27 = arith.addi %8, %c-1028477387_i32 : i32
    %c16_i32_6 = arith.constant 16 : i32
    %28 = arith.shrui %27, %c16_i32_6 : i32
    %29 = arith.xori %27, %28 : i32
    %c2146121005_i32_7 = arith.constant 2146121005 : i32
    %30 = arith.muli %29, %c2146121005_i32_7 : i32
    %c15_i32_8 = arith.constant 15 : i32
    %31 = arith.shrui %30, %c15_i32_8 : i32
    %32 = arith.xori %30, %31 : i32
    %c-2073254261_i32_9 = arith.constant -2073254261 : i32
    %33 = arith.muli %32, %c-2073254261_i32_9 : i32
    %c16_i32_10 = arith.constant 16 : i32
    %34 = arith.shrui %33, %c16_i32_10 : i32
    %35 = arith.xori %33, %34 : i32
    %36 = vector.broadcast %17 : i32 to vector<8x128xi32>
    %37 = arith.xori %7, %36 : vector<8x128xi32>
    %c16_i32_11 = arith.constant 16 : i32
    %38 = vector.broadcast %c16_i32_11 : i32 to vector<8x128xi32>
    %39 = arith.shrui %37, %38 : vector<8x128xi32>
    %40 = arith.xori %37, %39 : vector<8x128xi32>
    %c2146121005_i32_12 = arith.constant 2146121005 : i32
    %41 = vector.broadcast %c2146121005_i32_12 : i32 to vector<8x128xi32>
    %42 = arith.muli %40, %41 : vector<8x128xi32>
    %c15_i32_13 = arith.constant 15 : i32
    %43 = vector.broadcast %c15_i32_13 : i32 to vector<8x128xi32>
    %44 = arith.shrui %42, %43 : vector<8x128xi32>
    %45 = arith.xori %42, %44 : vector<8x128xi32>
    %c-2073254261_i32_14 = arith.constant -2073254261 : i32
    %46 = vector.broadcast %c-2073254261_i32_14 : i32 to vector<8x128xi32>
    %47 = arith.muli %45, %46 : vector<8x128xi32>
    %c16_i32_15 = arith.constant 16 : i32
    %48 = vector.broadcast %c16_i32_15 : i32 to vector<8x128xi32>
    %49 = arith.shrui %47, %48 : vector<8x128xi32>
    %50 = arith.xori %47, %49 : vector<8x128xi32>
    %c8_i32_16 = arith.constant 8 : i32
    %51 = vector.broadcast %c8_i32_16 : i32 to vector<8x128xi32>
    %52 = arith.shrui %50, %51 : vector<8x128xi32>
    %53 = arith.sitofp %52 : vector<8x128xi32> to vector<8x128xf32>
    %cst = arith.constant 5.96046448E-8 : f32
    %54 = vector.broadcast %cst : f32 to vector<8x128xf32>
    %55 = arith.mulf %53, %54 : vector<8x128xf32>
    %56 = vector.broadcast %26 : i32 to vector<8x128xi32>
    %57 = arith.xori %7, %56 : vector<8x128xi32>
    %c16_i32_17 = arith.constant 16 : i32
    %58 = vector.broadcast %c16_i32_17 : i32 to vector<8x128xi32>
    %59 = arith.shrui %57, %58 : vector<8x128xi32>
    %60 = arith.xori %57, %59 : vector<8x128xi32>
    %c2146121005_i32_18 = arith.constant 2146121005 : i32
    %61 = vector.broadcast %c2146121005_i32_18 : i32 to vector<8x128xi32>
    %62 = arith.muli %60, %61 : vector<8x128xi32>
    %c15_i32_19 = arith.constant 15 : i32
    %63 = vector.broadcast %c15_i32_19 : i32 to vector<8x128xi32>
    %64 = arith.shrui %62, %63 : vector<8x128xi32>
    %65 = arith.xori %62, %64 : vector<8x128xi32>
    %c-2073254261_i32_20 = arith.constant -2073254261 : i32
    %66 = vector.broadcast %c-2073254261_i32_20 : i32 to vector<8x128xi32>
    %67 = arith.muli %65, %66 : vector<8x128xi32>
    %c16_i32_21 = arith.constant 16 : i32
    %68 = vector.broadcast %c16_i32_21 : i32 to vector<8x128xi32>
    %69 = arith.shrui %67, %68 : vector<8x128xi32>
    %70 = arith.xori %67, %69 : vector<8x128xi32>
    %c8_i32_22 = arith.constant 8 : i32
    %71 = vector.broadcast %c8_i32_22 : i32 to vector<8x128xi32>
    %72 = arith.shrui %70, %71 : vector<8x128xi32>
    %73 = arith.sitofp %72 : vector<8x128xi32> to vector<8x128xf32>
    %cst_23 = arith.constant 5.96046448E-8 : f32
    %74 = vector.broadcast %cst_23 : f32 to vector<8x128xf32>
    %75 = arith.mulf %73, %74 : vector<8x128xf32>
    %76 = vector.broadcast %35 : i32 to vector<8x128xi32>
    %77 = arith.xori %7, %76 : vector<8x128xi32>
    %c16_i32_24 = arith.constant 16 : i32
    %78 = vector.broadcast %c16_i32_24 : i32 to vector<8x128xi32>
    %79 = arith.shrui %77, %78 : vector<8x128xi32>
    %80 = arith.xori %77, %79 : vector<8x128xi32>
    %c2146121005_i32_25 = arith.constant 2146121005 : i32
    %81 = vector.broadcast %c2146121005_i32_25 : i32 to vector<8x128xi32>
    %82 = arith.muli %80, %81 : vector<8x128xi32>
    %c15_i32_26 = arith.constant 15 : i32
    %83 = vector.broadcast %c15_i32_26 : i32 to vector<8x128xi32>
    %84 = arith.shrui %82, %83 : vector<8x128xi32>
    %85 = arith.xori %82, %84 : vector<8x128xi32>
    %c-2073254261_i32_27 = arith.constant -2073254261 : i32
    %86 = vector.broadcast %c-2073254261_i32_27 : i32 to vector<8x128xi32>
    %87 = arith.muli %85, %86 : vector<8x128xi32>
    %c16_i32_28 = arith.constant 16 : i32
    %88 = vector.broadcast %c16_i32_28 : i32 to vector<8x128xi32>
    %89 = arith.shrui %87, %88 : vector<8x128xi32>
    %90 = arith.xori %87, %89 : vector<8x128xi32>
    %c8_i32_29 = arith.constant 8 : i32
    %91 = vector.broadcast %c8_i32_29 : i32 to vector<8x128xi32>
    %92 = arith.shrui %90, %91 : vector<8x128xi32>
    %93 = arith.sitofp %92 : vector<8x128xi32> to vector<8x128xf32>
    %cst_30 = arith.constant 5.96046448E-8 : f32
    %94 = vector.broadcast %cst_30 : f32 to vector<8x128xf32>
    %95 = arith.mulf %93, %94 : vector<8x128xf32>
    %cst_31 = arith.constant 2.000000e-01 : f32
    %96 = vector.broadcast %cst_31 : f32 to vector<8x128xf32>
    %97 = arith.cmpf oge, %75, %96 : vector<8x128xf32>
    %cst_32 = arith.constant 1.250000e+00 : f32
    %98 = vector.broadcast %cst_32 : f32 to vector<8x128xf32>
    %99 = arith.mulf %55, %98 : vector<8x128xf32>
    %cst_33 = arith.constant 0.000000e+00 : f32
    %100 = vector.broadcast %cst_33 : f32 to vector<8x128xf32>
    %101 = arith.select %97, %99, %100 : vector<8x128xi1>, vector<8x128xf32>
    %c0_34 = arith.constant 0 : index
    %c0_35 = arith.constant 0 : index
    %102 = vector.load %arg2[%c0_34, %c0_35] : memref<128x128xf32, #tpu.memory_space<vmem>>, vector<128x128xf32>
    %cst_36 = arith.constant dense<0.000000e+00> : vector<8x128xf32>
    %103 = tpu.matmul %95, %102, %cst_36 {dimension_numbers = #tpu.dot_dimension_numbers<[1], [0], [0], [1], [0, 0, 1, 1], [], []>} : vector<8x128xf32>, vector<128x128xf32>, vector<8x128xf32> -> vector<8x128xf32>
    %c0_37 = arith.constant 0 : index
    %c0_38 = arith.constant 0 : index
    %104 = vector.load %arg3[%c0_37, %c0_38] : memref<1x128xf32, #tpu.memory_space<vmem>>, vector<1x128xf32>
    %105 = vector.broadcast %104 : vector<1x128xf32> to vector<8x128xf32>
    %106 = arith.addf %103, %105 : vector<8x128xf32>
    %107 = arith.addf %95, %101 : vector<8x128xf32>
    %108 = arith.addf %107, %106 : vector<8x128xf32>
    %c0_39 = arith.constant 0 : index
    %c0_40 = arith.constant 0 : index
    %109 = vector.load %arg4[%c0_39, %c0_40] : memref<8x128xf32, #tpu.memory_space<vmem>>, vector<8x128xf32>
    tpu.vector_store %arg4[%c0_39, %c0_40], %108 {strides = array<i32>} : memref<8x128xf32, #tpu.memory_space<vmem>>, vector<8x128xf32>,
    return
  }
  func.func @transform_0(%arg0: i32, %arg1: memref<1xi32, #tpu.memory_space<smem>>) -> (i32, i32) {
    %c0_i32 = arith.constant 0 : i32
    %c0_i32_0 = arith.constant 0 : i32
    %c0_i32_1 = arith.constant 0 : i32
    return %c0_i32, %c0_i32_0 : i32, i32
  }
  func.func @transform_1(%arg0: i32, %arg1: memref<1xi32, #tpu.memory_space<smem>>) -> (i32, i32) {
    %c0_i32 = arith.constant 0 : i32
    %c0_i32_0 = arith.constant 0 : i32
    %c0_i32_1 = arith.constant 0 : i32
    return %c0_i32, %c0_i32_0 : i32, i32
  }
  func.func @transform_2(%arg0: i32, %arg1: memref<1xi32, #tpu.memory_space<smem>>) -> (i32, i32) {
    %c0_i32 = arith.constant 0 : i32
    %c0_i32_0 = arith.constant 0 : i32
    return %arg0, %c0_i32 : i32, i32
  }
}

</mosaic_0001>

<bundles_post_ra>
// kernel: tpu_custom_call.1
= control target key start
LH: loop header
LB: loop body
LE: loop exit
PB: predicated region body
PF: predicated region fallthrough
CT: control target
= control target key end

     0   :  { %9 = vsyncpa [#allocation5], 0  ;;  %s387_s0 = inlined_call_operand.<no memory space> [shape: s32[1], index: 0, kind: input, shape index: {}]   ;;  %s388_s1 = inlined_call_operand.hbm [shape: f32[128,128], index: 1, kind: input, shape index: {}]   ;;  %s389_s2 = inlined_call_operand.vmem [shape: f32[1,128], index: 2, kind: input, shape index: {}]   ;;  %s390_s3 = inlined_call_operand.hbm [shape: f32[8,128], index: 3, kind: output, shape index: {}]  }
   0x1   :  { %10 = vsyncpa [#allocation6], 0  ;;  %s321_s12 = smov [#allocation4]  }
   0x2   :  { %s16_s13 = sshll.u32 %s321_s12, 4  ;;  %s17_s13 = int_to_ptr.vmem [resolvable:$true] %s16_s13 }
   0x3   :  { %s285_s14 = scalar_lea.vmem %s17_s13, 2048  ;;  %p290_p1 = scmp.lt.s32.totalorder %s17_s13, %s17_s13 }
   0x4   :  { %p286_p0 = scmp.ne.s32.totalorder %s17_s13, %s285_s14  ;;  %p291_p2 = scmp.lt.s32.totalorder %s285_s14, %s285_s14 }
   0x6   :  { %p292_p3 = por %p291_p2, %p290_p1 }
   0x8   :  { %p293_p4 = pnand %p292_p3, %p286_p0 }
   0xa   :  { %296 = shalt.err (!%p293_p4)
}
   0xb   :  { %s322_s15 = smov 128   ;;  %s323_s16 = smov 8  }
   0xc   :  { %22 = dma.hbm_to_vmem [thread:$0]  %s388_s1, 2048, %s17_s13, [#allocation5], %s322_s15, %s322_s15, %s323_s16  }
   0xd   :  { %317 = dma.done.wait [#allocation5], 2048  }
   0xe   :  { %318 = vsyncadd [#allocation5], 4294965248  ;;  %v28_v0 = vlaneseq  ;;  %s56_s21 = sadd.s32 3266489909, %s387_s0  ;;  %v324_v1 = vmov 0.0   ;;  %vm325_vm0 = vmmov 0  }
   0xf   :  { %236 = vmatprep.subr.mxu0 %v324_v1  ;;  %268 = vmatprep.mubr.msk.f32.mxu0 %vm325_vm0, %v324_v1  ;;  %s57_s22 = sshrl.u32 %s56_s21, 16  ;;  %v122_v5 = vld [vmem:[#allocation4 + $0x78] sm:$0xff]  ;;  %v121_v6 = vld [vmem:[#allocation4 + $0x70] sm:$0xff]  ;;  %v120_v8 = vld [vmem:[#allocation4 + $0x68] sm:$0xff]  ;;  %s38_s4 = sadd.s32 2654435769, %s387_s0 }
  0x10   :  { %v29_v2 = vshrl.u32 %v28_v0, 7  ;;  %s58_s23 = sxor.u32 %s57_s22, %s56_s21  ;;  %v31_v3 = vand.u32 127, %v28_v0  ;;  %237 = vmatpush3.msra.mxu0 %v122_v5  ;;  %v119_v9 = vld [vmem:[#allocation4 + $0x60] sm:$0xff]  ;;  %v118_v12 = vld [vmem:[#allocation4 + $0x58] sm:$0xff]  ;;  %v117_v14 = vld [vmem:[#allocation4 + $0x50] sm:$0xff]  ;;  %s39_s8 = sshrl.u32 %s38_s4, 16 }
  0x11   :  { %s59_s24 = smul.u32 2146121005, %s58_s23  ;;  %238 = vmatprep.subr.mxu0 %v324_v1  ;;  %v116_v16 = vld [vmem:[#allocation4 + $0x48] sm:$0xff]  ;;  %v115_v18 = vld [vmem:[#allocation4 + $0x40] sm:$0xff]  ;;  %v114_v20 = vld [vmem:[#allocation4 + $0x38] sm:$0xff]  ;;  %s40_s10 = sxor.u32 %s39_s8, %s38_s4 }
  0x12   :  { %v35_v4 = vmul.u32 128, %v29_v2  ;;  %239 = vmatpush3.msra.mxu0 %v121_v6  ;;  %v113_v22 = vld [vmem:[#allocation4 + $0x30] sm:$0xff]  ;;  %v112_v24 = vld [vmem:[#allocation4 + $0x28] sm:$0xff]  ;;  %v111_v26 = vld [vmem:[#allocation4 + $0x20] sm:$0xff]  ;;  %s47_s7 = sadd.s32 2246822507, %s387_s0 }
  0x13   :  { %s60_s1 = sshrl.u32 %s59_s24, 15  ;;  %240 = vmatprep.subr.mxu0 %v324_v1  ;;  %v110_v28 = vld [vmem:[#allocation4 + $0x18] sm:$0xff]  ;;  %v109_v30 = vld [vmem:[#allocation4 + $0x10] sm:$0xff]  ;;  %v108_v32 = vld [vmem:[#allocation4 + $0x8] sm:$0xff]  ;;  %s48_s9 = sshrl.u32 %s47_s7, 16 }
  0x14   :  { %s61_s25 = sxor.u32 %s60_s1, %s59_s24  ;;  %v355_v7 = vadd.s32 %v35_v4, %v31_v3  ;;  %241 = vmatpush3.msra.mxu0 %v120_v8  ;;  %v107_v33 = vld [vmem:[#allocation4] sm:$0xff]  ;;  %s49_s11 = sxor.u32 %s48_s9, %s47_s7 }
  0x15   :  { %s62_s26 = smul.u32 2221713035, %s61_s25  ;;  %242 = vmatprep.subr.mxu0 %v324_v1  ;;  %v218_v63 = vld [vmem:[%s389_s2] ss:$0 sm:$0xff]  ;;  %s326_s1 = smov [#allocation7]  }
  0x16   :  { %243 = vmatpush3.msra.mxu0 %v119_v9  ;;  %s41_s12 = smul.u32 2146121005, %s40_s10  ;;  %s209_s25 = sshll.u32 %s326_s1, 4  ;;  %s210_s25 = int_to_ptr.vmem [resolvable:$true] %s209_s25 }
  0x17   :  { %s63_s27 = sshrl.u32 %s62_s26, 16  ;;  %244 = vmatprep.subr.mxu0 %v324_v1  ;;  %s50_s13 = smul.u32 2146121005, %s49_s11 }
  0x18   :  { %s64_s28 = sxor.u32 %s63_s27, %s62_s26  ;;  %245 = vmatpush3.msra.mxu0 %v118_v12  ;;  %s42_s14 = sshrl.u32 %s41_s12, 15 }
  0x19   :  { %v91_v10 = vstv %s64_s28  ;;  %246 = vmatprep.subr.mxu0 %v324_v1  ;;  %s51_s15 = sshrl.u32 %s50_s13, 15  ;;  %s43_s16 = sxor.u32 %s42_s14, %s41_s12 }
  0x1a   :  { %v92_v11 = vxor.u32 %v91_v10, %v355_v7  ;;  %247 = vmatpush3.msra.mxu0 %v117_v14  ;;  %s52_s17 = sxor.u32 %s51_s15, %s50_s13  ;;  %s44_s18 = smul.u32 2221713035, %s43_s16 }
  0x1b   :  { %248 = vmatprep.subr.mxu0 %v324_v1  ;;  %s53_s19 = smul.u32 2221713035, %s52_s17  ;;  %s297_s26 = scalar_lea.vmem %s210_s25, 128 }
  0x1c   :  { %v93_v13 = vshrl.u32 %v92_v11, 16  ;;  %249 = vmatpush3.msra.mxu0 %v116_v16  ;;  %s45_s20 = sshrl.u32 %s44_s18, 16  ;;  %p298_p5 = scmp.ne.s32.totalorder %s210_s25, %s297_s26 }
  0x1d   :  { %250 = vmatprep.subr.mxu0 %v324_v1  ;;  %s54_s21 = sshrl.u32 %s53_s19, 16  ;;  %s46_s22 = sxor.u32 %s45_s20, %s44_s18 }
  0x1e   :  { %v94_v15 = vxor.u32 %v93_v13, %v92_v11  ;;  %251 = vmatpush3.msra.mxu0 %v115_v18  ;;  %s55_s23 = sxor.u32 %s54_s21, %s53_s19  ;;  %v65_v35 = vstv %s46_s22  ;;  %p302_p6 = scmp.lt.s32.totalorder %s210_s25, %s210_s25 }
  0x1f   :  { %252 = vmatprep.subr.mxu0 %v324_v1  ;;  %v78_v36 = vstv %s55_s23  ;;  %v66_v37 = vxor.u32 %v65_v35, %v355_v7  ;;  %p303_p7 = scmp.lt.s32.totalorder %s297_s26, %s297_s26 }
  0x20   :  { %v95_v17 = vmul.u32 2146121005, %v94_v15  ;;  %253 = vmatpush3.msra.mxu0 %v114_v20  ;;  %v79_v38 = vxor.u32 %v78_v36, %v355_v7 }
  0x21   :  { %254 = vmatprep.subr.mxu0 %v324_v1  ;;  %v67_v39 = vshrl.u32 %v66_v37, 16  ;;  %p304_p8 = por %p303_p7, %p302_p6 }
  0x22   :  { %v96_v19 = vshrl.u32 %v95_v17, 15  ;;  %255 = vmatpush3.msra.mxu0 %v113_v22  ;;  %v80_v40 = vshrl.u32 %v79_v38, 16 }
  0x23   :  { %256 = vmatprep.subr.mxu0 %v324_v1  ;;  %v68_v41 = vxor.u32 %v67_v39, %v66_v37  ;;  %p305_p9 = pnand %p304_p8, %p298_p5 }
  0x24   :  { %v97_v21 = vxor.u32 %v96_v19, %v95_v17  ;;  %257 = vmatpush3.msra.mxu0 %v112_v24  ;;  %v81_v42 = vxor.u32 %v80_v40, %v79_v38 }
  0x25   :  { %258 = vmatprep.subr.mxu0 %v324_v1  ;;  %v69_v43 = vmul.u32 2146121005, %v68_v41 }
  0x26   :  { %v98_v23 = vmul.u32 2221713035, %v97_v21  ;;  %259 = vmatpush3.msra.mxu0 %v111_v26  ;;  %v82_v44 = vmul.u32 2146121005, %v81_v42 }
  0x27   :  { %260 = vmatprep.subr.mxu0 %v324_v1  ;;  %v70_v45 = vshrl.u32 %v69_v43, 15 }
  0x28   :  { %v99_v25 = vshrl.u32 %v98_v23, 16  ;;  %261 = vmatpush3.msra.mxu0 %v110_v28  ;;  %v83_v46 = vshrl.u32 %v82_v44, 15 }
  0x29   :  { %262 = vmatprep.subr.mxu0 %v324_v1  ;;  %v71_v47 = vxor.u32 %v70_v45, %v69_v43 }
  0x2a   :  { %v100_v27 = vxor.u32 %v99_v25, %v98_v23  ;;  %263 = vmatpush3.msra.mxu0 %v109_v30  ;;  %v84_v48 = vxor.u32 %v83_v46, %v82_v44 }
  0x2b   :  { %264 = vmatprep.subr.mxu0 %v324_v1  ;;  %v72_v49 = vmul.u32 2221713035, %v71_v47 }
  0x2c   :  { %v101_v29 = vshrl.u32 %v100_v27, 8  ;;  %265 = vmatpush3.msra.mxu0 %v108_v32  ;;  %v85_v50 = vmul.u32 2221713035, %v84_v48 }
  0x2d   :  { %266 = vmatprep.subr.mxu0 %v324_v1  ;;  %v73_v51 = vshrl.u32 %v72_v49, 16 }
  0x2e   :  { %v102_v31 = vcvt.s32.f32 %v101_v29  ;;  %267 = vmatpush3.msra.mxu0 %v107_v33  ;;  %v86_v52 = vshrl.u32 %v85_v50, 16 }
  0x2f   :  { %v74_v53 = vxor.u32 %v73_v51, %v72_v49 }
  0x30   :  { %v103_v34 = vmul.f32 5.9604645e-08, %v102_v31  ;;  %v87_v54 = vxor.u32 %v86_v52, %v85_v50 }
  0x31   :  { %v75_v55 = vshrl.u32 %v74_v53, 8 }
  0x32   :  { %269 = vmatmul.mubr.f32.vlgmr.msra.gmra.mxu0 %v103_v34  ;;  %v88_v56 = vshrl.u32 %v87_v54, 8 }
  0x33   :  { %v76_v57 = vcvt.s32.f32 %v75_v55 }
  0x34   :  { %v89_v58 = vcvt.s32.f32 %v88_v56 }
  0x35   :  { %v77_v59 = vmul.f32 5.9604645e-08, %v76_v57 }
  0x36   :  { %v90_v60 = vmul.f32 5.9604645e-08, %v89_v58 }
  0x37   :  { %v105_v61 = vmul.f32 1.25, %v77_v59 }
  0x38   :  { %vm104_vm1 = vcmp.ge.f32.partialorder %v90_v60, 0.2 }
  0x39   :  { %v106_v62 = vsel %vm104_vm1, %v105_v61, 0.0 }
  0x3a   :  { %v200_v0 = vadd.f32 %v106_v62, %v103_v34 }
  0xf2   :  { %v196_v1 = vpop.f32.mrf.mxu0 }
  0xf3   :  { %v197_v2 = vadd.f32 %v218_v63, %v196_v1 }
  0xf4   :  { %v270_v3 = vpop.f32.mrf.mxu0 }
  0xf5   :  { %v201_v4 = vadd.f32 %v200_v0, %v197_v2 }
  0xf7   :  { %202 = vst [vmem:[#allocation7] sm:$0xff] %v201_v4 }
  0xf8   :  { %308 = shalt.err (!%p305_p9)
}
  0xf9   :  { %212 = dma.vmem_to_hbm [thread:$0]  %s210_s25, 128, %s390_s3, [#allocation6]  }
  0xfa   :  { %319 = dma.done.wait [#allocation6], 128  }
  0xfb   :  { %320 = vsyncadd [#allocation6], 4294967168 }
  0xfc   :  { %216 = vsyncpa [#allocation5], 1 }
  0xfd   :  { %217 = vsyncpa [#allocation6], 1 }

</bundles_post_ra>
